<compile_context>
chip_gen: v6e
topology: v6e:2x2x1
jax: 0.10.0
libtpu: 0.0.40
codegen_flags: <defaults>
</compile_context>

<pallas_src>
import functools
import math

import jax
import jax.numpy as jnp
from jax import lax
from jax.experimental import pallas as pl
from jax.experimental.pallas import tpu as pltpu

_MIB = 1024 * 1024


def _round_up(x: int, m: int) -> int:
    return ((x + m - 1) // m) * m


# --------------------------------------------------------------------------
# Fast path: table resident in VMEM, one-hot MXU gather.
# --------------------------------------------------------------------------
def _embed_onehot_kernel(ids_ref, tbl_ref, out_ref, *, scale):
    ids = ids_ref[...]                                    # (tile, 1) int32
    tile = ids.shape[0]
    vocab = tbl_ref.shape[0]
    iota = lax.broadcasted_iota(jnp.int32, (tile, vocab), 1)
    onehot = (ids == iota).astype(tbl_ref.dtype)          # (tile, V)
    acc = jnp.dot(onehot, tbl_ref[...], preferred_element_type=jnp.float32)
    out_ref[...] = (acc * scale).astype(out_ref.dtype)


def _embed_small_table(ids_flat, emb_table, *, tile, n_tiles, scale):
    n_pad = ids_flat.shape[0]
    V, D = emb_table.shape
    item = emb_table.dtype.itemsize
    ids_2d = ids_flat.reshape(n_pad, 1)

    need = (2 * V * D * item            # table (double-buffered by pipeline)
            + 2 * tile * D * item       # double-buffered out tile
            + tile * V * 4              # one-hot intermediate
            + tile * D * 4)             # f32 accumulator
    vmem_limit = int(max(32 * _MIB, min(48 * _MIB, 2 * need + 2 * _MIB)))

    kernel = functools.partial(_embed_onehot_kernel, scale=scale)
    return pl.pallas_call(
        kernel,
        out_shape=jax.ShapeDtypeStruct((n_pad, D), emb_table.dtype),
        grid_spec=pl.GridSpec(
            grid=(n_tiles,),
            in_specs=[
                pl.BlockSpec((tile, 1), lambda i: (i, 0)),   # token ids
                pl.BlockSpec((V, D), lambda i: (0, 0)),      # whole table, VMEM-resident
            ],
            out_specs=pl.BlockSpec((tile, D), lambda i: (i, 0)),
        ),
        compiler_params=pltpu.CompilerParams(
            dimension_semantics=("parallel",),
            vmem_limit_bytes=vmem_limit),
    )(ids_2d, emb_table)


# --------------------------------------------------------------------------
# Large-table path: HBM row gather with cross-step double-buffering.
# --------------------------------------------------------------------------
def _embed_gather_kernel(ids_ref, emb_hbm, out_ref, gather_buf, copy_sem,
                         *, scale, tile):
    """ids_ref: SMEM (N_pad,) int32 (scalar prefetch)
       emb_hbm: HBM (V, D) table
       out_ref: VMEM (tile, D) output tile
       gather_buf: VMEM (2, tile, D) double-buffered DMA landing buffer
       copy_sem: DMA semaphores, shape (2,), one per slot
    """
    step = pl.program_id(0)
    nsteps = pl.num_programs(0)
    slot = step & 1

    def issue(tile_idx, dst_slot):
        base = tile_idx * tile

        def body(t, carry):
            tok = ids_ref[base + t]                       # SMEM scalar read
            pltpu.make_async_copy(
                emb_hbm.at[pl.ds(tok, 1), :],
                gather_buf.at[dst_slot, pl.ds(t, 1), :],
                copy_sem.at[dst_slot],
            ).start()
            return carry

        lax.fori_loop(0, tile, body, 0, unroll=8)

    # Prime slot 0 on the first executed iteration (grid axis is "arbitrary",
    # hence strictly sequential).
    @pl.when(step == 0)
    def _():
        issue(0, 0)

    # Prefetch the NEXT tile's rows into the other slot before waiting on the
    # current slot (SMEM id reads stay ahead of the .wait()).
    @pl.when(step + 1 < nsteps)
    def _():
        issue(step + 1, 1 - slot)

    # Single tile-sized wait: every row copy of this slot signals the same
    # byte-counting semaphore with identical size, so one (tile, D) wait
    # consumes exactly this slot's `tile` row copies.
    pltpu.make_async_copy(
        emb_hbm.at[pl.ds(0, tile), :],
        gather_buf.at[slot],
        copy_sem.at[slot],
    ).wait()

    out_ref[...] = (gather_buf[slot].astype(jnp.float32) * scale
                    ).astype(out_ref.dtype)


def _embed_gather(ids_flat, emb_table, *, tile, n_tiles, scale):
    n_pad = ids_flat.shape[0]
    V, D = emb_table.shape
    item = emb_table.dtype.itemsize
    assert V >= tile, "gather path requires V >= tile (wait-descriptor shape)"

    # live VMEM ≈ 2 gather slots + double-buffered out tile
    need = 2 * tile * D * item + 2 * tile * D * item
    vmem_limit = int(max(32 * _MIB, min(48 * _MIB, 2 * need + 2 * _MIB)))

    kernel = functools.partial(_embed_gather_kernel, scale=scale, tile=tile)
    return pl.pallas_call(
        kernel,
        out_shape=jax.ShapeDtypeStruct((n_pad, D), emb_table.dtype),
        grid_spec=pltpu.PrefetchScalarGridSpec(
            num_scalar_prefetch=1,                    # ids -> SMEM
            grid=(n_tiles,),
            in_specs=[
                pl.BlockSpec(memory_space=pl.ANY),    # table stays in HBM
            ],
            out_specs=pl.BlockSpec((tile, D), lambda i, ids: (i, 0)),
            scratch_shapes=[
                pltpu.VMEM((2, tile, D), emb_table.dtype),  # 2 gather slots
                pltpu.SemaphoreType.DMA((2,)),              # per-slot DMA sems
            ],
        ),
        compiler_params=pltpu.CompilerParams(
            dimension_semantics=("arbitrary",),   # sequential: cross-step prefetch state
            vmem_limit_bytes=vmem_limit),
    )(ids_flat, emb_table)


# --------------------------------------------------------------------------
# Wrapper: forward of InputEmbeddingLayer.
# --------------------------------------------------------------------------
def input_embedding(token_ids, emb_table, *, tile=256, force_gather=False):
    """token_ids: (B, S) int ; emb_table: (V, D) float -> (B, S, D) float."""
    B, S = token_ids.shape
    V, D = emb_table.shape
    N = B * S
    item = emb_table.dtype.itemsize

    small_table = (V * D * item <= 4 * _MIB) and (V <= 2048) and not force_gather

    # Token tile: multiple of 8 (sublane), capped so gather-path live VMEM
    # (2 gather slots + double-buffered out ≈ 4*tile*D*item) stays <= ~16 MiB.
    tile = int(tile)
    while tile > 8 and 4 * tile * D * item > 16 * _MIB:
        tile //= 2
    if not small_table:
        tile = min(tile, max(8, (V // 8) * 8))
    tile = max(8, (min(tile, _round_up(N, 8)) // 8) * 8)

    n_tiles = (N + tile - 1) // tile
    n_pad = n_tiles * tile

    ids_flat = token_ids.reshape(-1).astype(jnp.int32)
    # TODO(synk): PyTorch nn.Embedding raises on out-of-range ids; the DMA
    # gather has no bounds check, so clamp ids instead of faulting.
    ids_flat = jnp.clip(ids_flat, 0, V - 1)
    if n_pad != N:
        ids_flat = jnp.pad(ids_flat, (0, n_pad - N))

    scale = math.sqrt(float(D))

    if small_table:
        out_flat = _embed_small_table(ids_flat, emb_table, tile=tile,
                                      n_tiles=n_tiles, scale=scale)
    else:
        out_flat = _embed_gather(ids_flat, emb_table, tile=tile,
                                 n_tiles=n_tiles, scale=scale)

    return out_flat[:N].reshape(B, S, D)


if __name__ == "__main__":
    key = jax.random.PRNGKey(0)
    k_emb, k_ids, k_emb2, k_ids2 = jax.random.split(key, 4)

    # --- small shapes consistent with the module (fast VMEM-table path) -----
    B, S = 2, 8
    vocab_size = 64
    model_dimension = 32
    emb_table = jax.random.normal(k_emb, (vocab_size, model_dimension),
                                  dtype=jnp.float32)
    token_ids = jax.random.randint(k_ids, (B, S), 0, vocab_size, dtype=jnp.int32)

    out = jax.block_until_ready(input_embedding(token_ids, emb_table))
    ref = emb_table[token_ids] * jnp.sqrt(jnp.float32(model_dimension))
    assert out.shape == (B, S, model_dimension)
    assert jnp.allclose(out, ref, atol=1e-5, rtol=1e-5)

    # --- also exercise the double-buffered HBM-gather path ------------------
    V2, D2 = 512, 256
    emb2 = jax.random.normal(k_emb2, (V2, D2), dtype=jnp.float32)
    ids2 = jax.random.randint(k_ids2, (B, S), 0, V2, dtype=jnp.int32)
    out2 = jax.block_until_ready(
        input_embedding(ids2, emb2, tile=8, force_gather=True))
    ref2 = emb2[ids2] * jnp.sqrt(jnp.float32(D2))
    assert out2.shape == (B, S, D2)
    assert jnp.allclose(out2, ref2, atol=1e-5, rtol=1e-5)

    print("KERNEL_OK")
</pallas_src>

<mosaic_0001>
module attributes {stable_mosaic.version = 11 : i64} {
  func.func @_embed_onehot_kernel(%arg0: i32, %arg1: memref<16x1xi32, #tpu.memory_space<vmem>>, %arg2: memref<64x32xf32, #tpu.memory_space<vmem>>, %arg3: memref<16x32xf32, #tpu.memory_space<vmem>>) attributes {dimension_semantics = [#tpu.dimension_semantics<parallel>], iteration_bounds = array<i64: 1>, scalar_prefetch = 0 : i64, scratch_operands = 0 : i64, tpu.core_type = #tpu.core_type<tc>, window_params = [{transform_indices = @transform_0, window_bounds = array<i64: 16, 1>}, {pipeline_mode = #tpu.pipeline_mode<synchronous>, transform_indices = @transform_1, window_bounds = array<i64: 64, 32>}, {transform_indices = @transform_2, window_bounds = array<i64: 16, 32>}]} {
    %c0 = arith.constant 0 : index
    %c0_0 = arith.constant 0 : index
    %0 = vector.load %arg1[%c0, %c0_0] : memref<16x1xi32, #tpu.memory_space<vmem>>, vector<16x1xi32>
    %1 = tpu.iota {dimensions = array<i32: 1>} : vector<16x64xi32>
    %2 = vector.broadcast %0 : vector<16x1xi32> to vector<16x64xi32>
    %3 = arith.cmpi eq, %2, %1 : vector<16x64xi32>
    %4 = arith.extui %3 : vector<16x64xi1> to vector<16x64xi32>
    %5 = arith.sitofp %4 : vector<16x64xi32> to vector<16x64xf32>
    %c0_1 = arith.constant 0 : index
    %c0_2 = arith.constant 0 : index
    %6 = vector.load %arg2[%c0_1, %c0_2] : memref<64x32xf32, #tpu.memory_space<vmem>>, vector<64x32xf32>
    %cst = arith.constant dense<0.000000e+00> : vector<16x32xf32>
    %7 = tpu.matmul %5, %6, %cst {dimension_numbers = #tpu.dot_dimension_numbers<[1], [0], [0], [1], [0, 0, 1, 1], [], []>} : vector<16x64xf32>, vector<64x32xf32>, vector<16x32xf32> -> vector<16x32xf32>
    %cst_3 = arith.constant 5.65685415 : f32
    %8 = vector.broadcast %cst_3 : f32 to vector<16x32xf32>
    %9 = arith.mulf %7, %8 : vector<16x32xf32>
    %c0_4 = arith.constant 0 : index
    %c0_5 = arith.constant 0 : index
    %10 = vector.load %arg3[%c0_4, %c0_5] : memref<16x32xf32, #tpu.memory_space<vmem>>, vector<16x32xf32>
    tpu.vector_store %arg3[%c0_4, %c0_5], %9 {strides = array<i32>} : memref<16x32xf32, #tpu.memory_space<vmem>>, vector<16x32xf32>,
    return
  }
  func.func @transform_0(%arg0: i32) -> (i32, i32) {
    %c0_i32 = arith.constant 0 : i32
    %c0_i32_0 = arith.constant 0 : i32
    return %arg0, %c0_i32 : i32, i32
  }
  func.func @transform_1(%arg0: i32) -> (i32, i32) {
    %c0_i32 = arith.constant 0 : i32
    %c0_i32_0 = arith.constant 0 : i32
    %c0_i32_1 = arith.constant 0 : i32
    return %c0_i32, %c0_i32_0 : i32, i32
  }
  func.func @transform_2(%arg0: i32) -> (i32, i32) {
    %c0_i32 = arith.constant 0 : i32
    %c0_i32_0 = arith.constant 0 : i32
    return %arg0, %c0_i32 : i32, i32
  }
}

</mosaic_0001>

<bundles_post_ra>
// kernel: tpu_custom_call.1
= control target key start
LH: loop header
LB: loop body
LE: loop exit
PB: predicated region body
PF: predicated region fallthrough
CT: control target
= control target key end

     0   :  { %v200_v2 = vmov 0   ;;  %s253_s0 = inlined_call_operand.vmem [shape: s32[16,1], index: 0, kind: input, shape index: {}]   ;;  %s254_s1 = inlined_call_operand.vmem [shape: f32[64,32], index: 1, kind: input, shape index: {}]   ;;  %s255_s2 = inlined_call_operand.hbm [shape: f32[16,32], index: 2, kind: output, shape index: {}]  }
   0x1   :  { %v12_v0 = vld [vmem:[%s253_s0] sm:$0xff]  ;;  %v35_v1 = vld [vmem:[%s254_s1 + $0x38] sm:$0xff]  ;;  %177 = vset.pattern.permute.xlu0 %v200_v2  ;;  %v34_v3 = vld [vmem:[%s254_s1 + $0x30] sm:$0xff] }
   0x2   :  { %153 = vmatprep.subr.mxu0 %v35_v1  ;;  %17 = vperm.xlu0 %177, %v12_v0   ;;  %v33_v4 = vld [vmem:[%s254_s1 + $0x28] sm:$0xff] }
   0x3   :  { %154 = vmatpush3.msra.mxu0 %v35_v1  ;;  %v13_v5 = vld [vmem:[%s253_s0 + $0x8] sm:$0xff] }
   0x4   :  { %155 = vmatprep.subr.mxu0 %v34_v3 }
   0x5   :  { %7 = vsyncpa [#allocation3], 0  ;;  %156 = vmatpush3.msra.mxu0 %v34_v3  ;;  %v32_v6 = vld [vmem:[%s254_s1 + $0x20] sm:$0xff]  ;;  %v31_v7 = vld [vmem:[%s254_s1 + $0x18] sm:$0xff]  ;;  %v14_v11 = vlaneseq  ;;  %vm36_vm0 = vcmask 523264   ;;  %v201_v14 = vmov 0.0  }
   0x6   :  { %157 = vmatprep.subr.mxu0 %v33_v4  ;;  %20 = vperm.xlu0 %177, %v13_v5   ;;  %v30_v8 = vld [vmem:[%s254_s1 + $0x10] sm:$0xff]  ;;  %v29_v9 = vld [vmem:[%s254_s1 + $0x8] sm:$0xff]  ;;  %v28_v10 = vld [vmem:[%s254_s1] sm:$0xff]  ;;  %s202_s28 = smov [#allocation2]   ;;  %vm120_vm3 = vcmask 261120  }
   0x7   :  { %158 = vmatpush3.msra.mxu0 %v33_v4  ;;  %v15_v12 = vand.u32 127, %v14_v11  ;;  %s128_s29 = sshll.u32 %s202_s28, 4  ;;  %s129_s29 = int_to_ptr.vmem [resolvable:$true] %s128_s29 }
   0x8   :  { %159 = vmatprep.subr.mxu0 %v32_v6  ;;  %s178_s1 = scalar_lea.vmem %s129_s29, 256  ;;  %p183_p1 = scmp.lt.s32.totalorder %s129_s29, %s129_s29 }
   0x9   :  { %160 = vmatpush3.msra.mxu0 %v32_v6  ;;  %p179_p0 = scmp.ne.s32.totalorder %s129_s29, %s178_s1  ;;  %p184_p2 = scmp.lt.s32.totalorder %s178_s1, %s178_s1 }
   0xa   :  { %161 = vmatprep.subr.mxu0 %v31_v7 }
   0xb   :  { %162 = vmatpush3.msra.mxu0 %v31_v7  ;;  %p185_p3 = por %p184_p2, %p183_p1 }
   0xc   :  { %163 = vmatprep.subr.mxu0 %v30_v8 }
   0xd   :  { %164 = vmatpush3.msra.mxu0 %v30_v8  ;;  %p186_p4 = pnand %p185_p3, %p179_p0 }
   0xe   :  { %165 = vmatprep.subr.mxu0 %v29_v9 }
   0xf   :  { %166 = vmatpush3.msra.mxu0 %v29_v9 }
  0x10   :  { %167 = vmatprep.subr.mxu0 %v28_v10 }
  0x11   :  { %168 = vmatpush3.msra.mxu0 %v28_v10 }
  0x7d   :  { %v18_v13 = vpop.permute.xlu0 %17 }
  0x7e   :  { %vm22_vm1 = vcmp.eq.s32.totalorder %v18_v13, %v15_v12 }
  0x7f   :  { %v139_v15 = vsel %vm22_vm1, 1.0, %v201_v14 }
  0x80   :  { %169 = vmatprep.mubr.msk.f32.mxu0 %vm36_vm0, %v139_v15 }
  0x81   :  { %v21_v16 = vpop.permute.xlu0 %20 }
  0x82   :  { %vm23_vm2 = vcmp.eq.s32.totalorder %v21_v16, %v15_v12 }
  0x83   :  { %v140_v17 = vsel %vm23_vm2, 1.0, %v201_v14 }
  0x84   :  { %170 = vmatmul.mubr.msk.f32.vlgmr.msra.gmra.mxu0 %vm36_vm0, %v140_v17 }
 0x144   :  { %v171_v18 = vpop.f32.mrf.mxu0 }
 0x145   :  { %v119_v19 = vmul.f32 5.656854, %v171_v18 }
 0x146   :  { %v109_v20 = vpop.f32.mrf.mxu0 }
 0x147   :  { %122 = vst.msk [vmem:[#allocation2 + $0x8] sm:$0xff] %vm120_vm3, %v119_v19  ;;  %v118_v21 = vmul.f32 5.656854, %v109_v20 }
 0x149   :  { %121 = vst.msk [vmem:[#allocation2] sm:$0xff] %vm120_vm3, %v118_v21 }
 0x14a   :  { %189 = shalt.err (!%p186_p4)
}
 0x14b   :  { %s203_s30 = smov 128   ;;  %s204_s3 = smov 8  }
 0x14c   :  { %134 = dma.vmem_to_hbm [thread:$0]  %s129_s29, 256, %s255_s2, [#allocation3], %s203_s30, %s203_s30, %s204_s3  }
 0x14d   :  { %198 = dma.done.wait [#allocation3], 256  }
 0x14e   :  { %199 = vsyncadd [#allocation3], 4294967040 }
 0x14f   :  { %138 = vsyncpa [#allocation3], 1 }

</bundles_post_ra>
